<compile_context>
chip_gen: v7x
topology: tpu7x:2x2x1
jax: 0.10.0
libtpu: 0.0.40
codegen_flags: <defaults>
</compile_context>

<pallas_src>
import functools

import jax
import jax.numpy as jnp
from jax.experimental import pallas as pl
from jax.experimental.pallas import tpu as pltpu


def _make_kernel(V, C, s_tile):
    n_sub = s_tile // 128  # number of 128-lane sub-chunks per grid step

    def kernel(x_ref, w_ref, b_ref, pooled_ref, aux_ref, acc_ref):
        # x_ref:      (1, V, C, S_TILE)  bf16 chunk of one batch element
        # w_ref:      (C, F)             f32 weight, pre-scaled by 1/S
        # b_ref:      (1, F)             f32 bias
        # pooled_ref: (1, 1, F)          f32 max over views
        # aux_ref:    (1, V, F)          f32 per-view features
        # acc_ref:    (V, C, 128)        f32 partial-sum accumulator (scratch)
        k = pl.program_id(1)

        @pl.when(k == 0)
        def _init():
            acc_ref[...] = jnp.zeros_like(acc_ref)

        # Bulk of the spatial reduction on the VPU: sum 128-lane sub-chunks
        # (f32 accumulation of bf16 data); no lane reduce on this hot path.
        partial = x_ref[0, :, :, 0:128].astype(jnp.float32)
        for j in range(1, n_sub):
            partial = partial + x_ref[0, :, :, j * 128:(j + 1) * 128].astype(
                jnp.float32)
        acc_ref[...] += partial  # (V, C, 128)

        @pl.when(k == pl.num_programs(1) - 1)
        def _finalize():
            # Single lane (XLU) reduce, then tiny (V,C)@(C,F) matmul + bias.
            sums = jnp.sum(acc_ref[...], axis=-1)               # (V, C)
            out = jnp.dot(sums, w_ref[...],
                          preferred_element_type=jnp.float32) + b_ref[...]
            aux_ref[...] = out[jnp.newaxis].astype(aux_ref.dtype)
            pooled_ref[...] = jnp.max(out, axis=0, keepdims=True)[
                jnp.newaxis].astype(pooled_ref.dtype)

    return kernel


@functools.partial(jax.jit, static_argnames=("s_tile", "cast_bf16"))
def view_max_aggregate(mvimages, weight, bias, *, s_tile=512, cast_bf16=True):
    """mvimages: (B, V, C, D, H, W) f32; weight: (C, F); bias: (F,)."""
    B, V, C, D, H, W = mvimages.shape
    F = weight.shape[1]
    S = D * H * W

    # Lane tile: multiple of 128, capped at s_tile, never larger than needed.
    s_pad128 = ((S + 127) // 128) * 128
    st = min(max(128, (s_tile // 128) * 128), s_pad128)
    S_pad = ((S + st - 1) // st) * st          # zero-pad: zeros don't affect sums
    n_k = S_pad // st

    x = mvimages.reshape(B, V, C, S)
    if cast_bf16:
        x = x.astype(jnp.bfloat16)             # halve HBM traffic; accum stays f32
    if S_pad != S:
        x = jnp.pad(x, ((0, 0), (0, 0), (0, 0), (0, S_pad - S)))

    # Fold the 1/S of the global average pool into the (tiny) weight.
    w_scaled = (weight / S).astype(jnp.float32)
    b2 = bias.reshape(1, F).astype(jnp.float32)

    kernel = _make_kernel(V, C, st)
    # TODO(synk): real backbones are arbitrary nn.Modules; only the synthetic
    # GAP+Linear backbone is fused here.  Per-step batching of multiple B rows
    # (to fill the MXU M dim) is left out to keep the block layout simple.

    pooled, aux = pl.pallas_call(
        kernel,
        out_shape=(
            jax.ShapeDtypeStruct((B, 1, F), jnp.float32),   # pooled (pre-squeeze)
            jax.ShapeDtypeStruct((B, V, F), jnp.float32),   # aux
        ),
        grid=(B, n_k),
        in_specs=[
            pl.BlockSpec((1, V, C, st), lambda b, k: (b, 0, 0, k)),
            pl.BlockSpec((C, F), lambda b, k: (0, 0)),
            pl.BlockSpec((1, F), lambda b, k: (0, 0)),
        ],
        out_specs=[
            pl.BlockSpec((1, 1, F), lambda b, k: (b, 0, 0)),
            pl.BlockSpec((1, V, F), lambda b, k: (b, 0, 0)),
        ],
        scratch_shapes=[pltpu.VMEM((V, C, 128), jnp.float32)],
        compiler_params=pltpu.CompilerParams(
            dimension_semantics=("parallel", "arbitrary")),
    )(x, w_scaled, b2)

    pooled_view = jnp.squeeze(pooled.reshape(B, F))   # matches torch .squeeze()
    return pooled_view, aux


def _reference(mvimages, weight, bias):
    B, V, C, D, H, W = mvimages.shape
    batched = mvimages.reshape(B * V, C, D, H, W)
    feat = batched.mean(axis=(2, 3, 4))                      # model: GAP
    feat = feat @ weight + bias                              # model: Linear
    aux = feat.reshape(B, V, -1)
    pooled = jnp.max(aux, axis=1)
    return jnp.squeeze(pooled), aux


if __name__ == "__main__":
    # S = D*H*W = 1024 -> two 512-lane reduction steps (exercises the
    # accumulator / finalize path of the tiled kernel).
    B, V, C, D, H, W = 2, 3, 4, 4, 16, 16
    F = 32

    key = jax.random.PRNGKey(0)
    k_x, k_w, k_b = jax.random.split(key, 3)
    mvimages = jax.random.normal(k_x, (B, V, C, D, H, W), dtype=jnp.float32)
    weight = jax.random.normal(k_w, (C, F), dtype=jnp.float32) * 0.1
    bias = jax.random.normal(k_b, (F,), dtype=jnp.float32) * 0.01

    pooled_view, aux = view_max_aggregate(mvimages, weight, bias)
    jax.block_until_ready((pooled_view, aux))

    assert pooled_view.shape == (B, F) and aux.shape == (B, V, F)

    # Tight check: kernel math vs. a reference fed the same bf16-quantized input.
    mv_q = mvimages.astype(jnp.bfloat16).astype(jnp.float32)
    ref_pooled_q, ref_aux_q = _reference(mv_q, weight, bias)
    assert jnp.allclose(pooled_view, ref_pooled_q, atol=1e-5, rtol=1e-5)
    assert jnp.allclose(aux, ref_aux_q, atol=1e-5, rtol=1e-5)

    # Loose check vs. the pure-f32 reference (only delta: bf16 input quantization).
    ref_pooled, ref_aux = _reference(mvimages, weight, bias)
    assert jnp.allclose(pooled_view, ref_pooled, atol=5e-3, rtol=5e-3)
    assert jnp.allclose(aux, ref_aux, atol=5e-3, rtol=5e-3)

    print("KERNEL_OK")
</pallas_src>

<mosaic_0001>
module attributes {stable_mosaic.version = 11 : i64} {
  func.func @kernel(%arg0: i32, %arg1: i32, %arg2: memref<1x3x4x512xbf16, #tpu.memory_space<vmem>>, %arg3: memref<4x32xf32, #tpu.memory_space<vmem>>, %arg4: memref<1x32xf32, #tpu.memory_space<vmem>>, %arg5: memref<1x1x32xf32, #tpu.memory_space<vmem>>, %arg6: memref<1x3x32xf32, #tpu.memory_space<vmem>>, %arg7: memref<3x4x128xf32, #tpu.memory_space<vmem>>) attributes {dimension_semantics = [#tpu.dimension_semantics<parallel>, #tpu.dimension_semantics<arbitrary>], iteration_bounds = array<i64: 2, 2>, scalar_prefetch = 0 : i64, scratch_operands = 1 : i64, tpu.core_type = #tpu.core_type<tc>, window_params = [{transform_indices = @transform_0, window_bounds = array<i64: 1, 3, 4, 512>}, {pipeline_mode = #tpu.pipeline_mode<synchronous>, transform_indices = @transform_1, window_bounds = array<i64: 4, 32>}, {pipeline_mode = #tpu.pipeline_mode<synchronous>, transform_indices = @transform_2, window_bounds = array<i64: 1, 32>}, {transform_indices = @transform_3, window_bounds = array<i64: 1, 1, 32>}, {transform_indices = @transform_4, window_bounds = array<i64: 1, 3, 32>}]} {
    %c0_i32 = arith.constant 0 : i32
    %0 = arith.cmpi eq, %arg1, %c0_i32 : i32
    %1 = arith.extui %0 : i1 to i32
    %c0_i32_0 = arith.constant 0 : i32
    %2 = arith.cmpi ne, %1, %c0_i32_0 : i32
    scf.if %2 {
      %cst = arith.constant 0.000000e+00 : f32
      %24 = vector.broadcast %cst : f32 to vector<3x4x128xf32>
      %c0_20 = arith.constant 0 : index
      %c0_21 = arith.constant 0 : index
      %c0_22 = arith.constant 0 : index
      %25 = vector.load %arg7[%c0_20, %c0_21, %c0_22] : memref<3x4x128xf32, #tpu.memory_space<vmem>>, vector<3x4x128xf32>
      tpu.vector_store %arg7[%c0_20, %c0_21, %c0_22], %24 {strides = array<i32>} : memref<3x4x128xf32, #tpu.memory_space<vmem>>, vector<3x4x128xf32>,
    } else {
    }
    %c0 = arith.constant 0 : index
    %c0_1 = arith.constant 0 : index
    %c0_2 = arith.constant 0 : index
    %c0_3 = arith.constant 0 : index
    %3 = vector.load %arg2[%c0, %c0_1, %c0_2, %c0_3] : memref<1x3x4x512xbf16, #tpu.memory_space<vmem>>, vector<1x3x4x128xbf16>
    %4 = vector.shape_cast %3 : vector<1x3x4x128xbf16> to vector<3x4x128xbf16>
    %5 = arith.extf %4 : vector<3x4x128xbf16> to vector<3x4x128xf32>
    %c0_4 = arith.constant 0 : index
    %c0_5 = arith.constant 0 : index
    %c0_6 = arith.constant 0 : index
    %c128 = arith.constant 128 : index
    %6 = vector.load %arg2[%c0_4, %c0_5, %c0_6, %c128] : memref<1x3x4x512xbf16, #tpu.memory_space<vmem>>, vector<1x3x4x128xbf16>
    %7 = vector.shape_cast %6 : vector<1x3x4x128xbf16> to vector<3x4x128xbf16>
    %8 = arith.extf %7 : vector<3x4x128xbf16> to vector<3x4x128xf32>
    %9 = arith.addf %5, %8 : vector<3x4x128xf32>
    %c0_7 = arith.constant 0 : index
    %c0_8 = arith.constant 0 : index
    %c0_9 = arith.constant 0 : index
    %c256 = arith.constant 256 : index
    %10 = vector.load %arg2[%c0_7, %c0_8, %c0_9, %c256] : memref<1x3x4x512xbf16, #tpu.memory_space<vmem>>, vector<1x3x4x128xbf16>
    %11 = vector.shape_cast %10 : vector<1x3x4x128xbf16> to vector<3x4x128xbf16>
    %12 = arith.extf %11 : vector<3x4x128xbf16> to vector<3x4x128xf32>
    %13 = arith.addf %9, %12 : vector<3x4x128xf32>
    %c0_10 = arith.constant 0 : index
    %c0_11 = arith.constant 0 : index
    %c0_12 = arith.constant 0 : index
    %c384 = arith.constant 384 : index
    %14 = vector.load %arg2[%c0_10, %c0_11, %c0_12, %c384] : memref<1x3x4x512xbf16, #tpu.memory_space<vmem>>, vector<1x3x4x128xbf16>
    %15 = vector.shape_cast %14 : vector<1x3x4x128xbf16> to vector<3x4x128xbf16>
    %16 = arith.extf %15 : vector<3x4x128xbf16> to vector<3x4x128xf32>
    %17 = arith.addf %13, %16 : vector<3x4x128xf32>
    %c0_13 = arith.constant 0 : index
    %c0_14 = arith.constant 0 : index
    %c0_15 = arith.constant 0 : index
    %18 = vector.load %arg7[%c0_13, %c0_14, %c0_15] : memref<3x4x128xf32, #tpu.memory_space<vmem>>, vector<3x4x128xf32>
    %19 = arith.addf %18, %17 : vector<3x4x128xf32>
    %c0_16 = arith.constant 0 : index
    %c0_17 = arith.constant 0 : index
    %c0_18 = arith.constant 0 : index
    %20 = vector.load %arg7[%c0_16, %c0_17, %c0_18] : memref<3x4x128xf32, #tpu.memory_space<vmem>>, vector<3x4x128xf32>
    tpu.vector_store %arg7[%c0_16, %c0_17, %c0_18], %19 {strides = array<i32>} : memref<3x4x128xf32, #tpu.memory_space<vmem>>, vector<3x4x128xf32>,
    %c1_i32 = arith.constant 1 : i32
    %21 = arith.cmpi eq, %arg1, %c1_i32 : i32
    %22 = arith.extui %21 : i1 to i32
    %c0_i32_19 = arith.constant 0 : i32
    %23 = arith.cmpi ne, %22, %c0_i32_19 : i32
    scf.if %23 {
      %c0_20 = arith.constant 0 : index
      %c0_21 = arith.constant 0 : index
      %c0_22 = arith.constant 0 : index
      %24 = vector.load %arg7[%c0_20, %c0_21, %c0_22] : memref<3x4x128xf32, #tpu.memory_space<vmem>>, vector<3x4x128xf32>
      %cst = arith.constant dense<0.000000e+00> : vector<3x4xf32>
      %25 = vector.multi_reduction <add>, %24, %cst [2] : vector<3x4x128xf32> to vector<3x4xf32>
      %c0_23 = arith.constant 0 : index
      %c0_24 = arith.constant 0 : index
      %26 = vector.load %arg3[%c0_23, %c0_24] : memref<4x32xf32, #tpu.memory_space<vmem>>, vector<4x32xf32>
      %cst_25 = arith.constant dense<0.000000e+00> : vector<3x32xf32>
      %27 = tpu.matmul %25, %26, %cst_25 {dimension_numbers = #tpu.dot_dimension_numbers<[1], [0], [0], [1], [0, 0, 1, 1], [], []>} : vector<3x4xf32>, vector<4x32xf32>, vector<3x32xf32> -> vector<3x32xf32>
      %c0_26 = arith.constant 0 : index
      %c0_27 = arith.constant 0 : index
      %28 = vector.load %arg4[%c0_26, %c0_27] : memref<1x32xf32, #tpu.memory_space<vmem>>, vector<1x32xf32>
      %29 = vector.broadcast %28 : vector<1x32xf32> to vector<3x32xf32>
      %30 = arith.addf %27, %29 : vector<3x32xf32>
      %31 = vector.shape_cast %30 : vector<3x32xf32> to vector<1x3x32xf32>
      %c0_28 = arith.constant 0 : index
      %c0_29 = arith.constant 0 : index
      %c0_30 = arith.constant 0 : index
      %32 = vector.load %arg6[%c0_28, %c0_29, %c0_30] : memref<1x3x32xf32, #tpu.memory_space<vmem>>, vector<1x3x32xf32>
      tpu.vector_store %arg6[%c0_28, %c0_29, %c0_30], %31 {strides = array<i32>} : memref<1x3x32xf32, #tpu.memory_space<vmem>>, vector<1x3x32xf32>,
      %cst_31 = arith.constant dense<0xFF800000> : vector<32xf32>
      %33 = vector.multi_reduction <maximumf>, %30, %cst_31 [0] : vector<3x32xf32> to vector<32xf32>
      %34 = vector.shape_cast %33 : vector<32xf32> to vector<1x32xf32>
      %35 = vector.shape_cast %34 : vector<1x32xf32> to vector<1x1x32xf32>
      %c0_32 = arith.constant 0 : index
      %c0_33 = arith.constant 0 : index
      %c0_34 = arith.constant 0 : index
      %36 = vector.load %arg5[%c0_32, %c0_33, %c0_34] : memref<1x1x32xf32, #tpu.memory_space<vmem>>, vector<1x1x32xf32>
      tpu.vector_store %arg5[%c0_32, %c0_33, %c0_34], %35 {strides = array<i32>} : memref<1x1x32xf32, #tpu.memory_space<vmem>>, vector<1x1x32xf32>,
    } else {
    }
    return
  }
  func.func @transform_0(%arg0: i32, %arg1: i32) -> (i32, i32, i32, i32) {
    %c0_i32 = arith.constant 0 : i32
    %c0_i32_0 = arith.constant 0 : i32
    %c0_i32_1 = arith.constant 0 : i32
    return %arg0, %c0_i32, %c0_i32_0, %arg1 : i32, i32, i32, i32
  }
  func.func @transform_1(%arg0: i32, %arg1: i32) -> (i32, i32) {
    %c0_i32 = arith.constant 0 : i32
    %c0_i32_0 = arith.constant 0 : i32
    %c0_i32_1 = arith.constant 0 : i32
    return %c0_i32, %c0_i32_0 : i32, i32
  }
  func.func @transform_2(%arg0: i32, %arg1: i32) -> (i32, i32) {
    %c0_i32 = arith.constant 0 : i32
    %c0_i32_0 = arith.constant 0 : i32
    %c0_i32_1 = arith.constant 0 : i32
    return %c0_i32, %c0_i32_0 : i32, i32
  }
  func.func @transform_3(%arg0: i32, %arg1: i32) -> (i32, i32, i32) {
    %c0_i32 = arith.constant 0 : i32
    %c0_i32_0 = arith.constant 0 : i32
    %c0_i32_1 = arith.constant 0 : i32
    return %arg0, %c0_i32, %c0_i32_0 : i32, i32, i32
  }
  func.func @transform_4(%arg0: i32, %arg1: i32) -> (i32, i32, i32) {
    %c0_i32 = arith.constant 0 : i32
    %c0_i32_0 = arith.constant 0 : i32
    %c0_i32_1 = arith.constant 0 : i32
    return %arg0, %c0_i32, %c0_i32_0 : i32, i32, i32
  }
}

</mosaic_0001>

<bundles_post_ra>
// kernel: view_max_aggregate.1
= control target key start
LH: loop header
LB: loop body
LE: loop exit
PB: predicated region body
PF: predicated region fallthrough
CT: control target
= control target key end

     0   :  { %10 = vsyncpa [#allocation5], 0  ;;  %s1008_s0 = inlined_call_operand.vmem [shape: bf16[2,3,4,1024], index: 0, kind: input, shape index: {}]   ;;  %s1009_s1 = inlined_call_operand.vmem [shape: f32[4,32], index: 1, kind: input, shape index: {}]   ;;  %s1010_s2 = inlined_call_operand.vmem [shape: f32[1,32], index: 2, kind: input, shape index: {}]   ;;  %s1011_s3 = inlined_call_operand.hbm [shape: f32[2,1,32], index: 3, kind: output, shape index: {0}]   ;;  %s1012_s4 = inlined_call_operand.vmem [shape: f32[2,3,32], index: 4, kind: output, shape index: {1}]  }
   0x1   :  { %12 = vsyncpa [#allocation5 + $0x1], 0  ;;  %s824_s15 = smov 0   ;;  %s826_s16 = smov 0  }
   0x2   :  { %s828_s17 = smov 0   ;;  %s830_s18 = smov 0  }
   0x3   :  { %s832_s19 = smov 0   ;;  %s834_s20 = smov 0  }
   0x4   :  { %s836_s21 = smov 0   ;;  %s838_s22 = smov 0  }
   0x5   :  { %s840_s23 = smov 0   ;;  %s842_s24 = smov 0  }
   0x6 LB: > { %s567_s25 = sadd.s32 4294967295, %s793_s24   ;;  %s568_s26 = sadd.s32 4294967294, %s793_s24   ;;  %s793_s24 = sphi %s842_s24, %s18_s24   ;;  %s789_s23 = sphi %s840_s23, %s1027_s23   ;;  %s785_s22 = sphi %s838_s22, %s1026_s22   ;;  %s781_s21 = sphi %s836_s21, %s1025_s21   ;;  %s777_s20 = sphi %s834_s20, %s1024_s20   ;;  %s773_s19 = sphi %s832_s19, %s1023_s19   ;;  %s769_s18 = sphi %s830_s18, %s1022_s18   ;;  %s765_s17 = sphi %s828_s17, %s1021_s17   ;;  %s761_s16 = sphi %s826_s16, %s1020_s16   ;;  %s757_s15 = sphi %s824_s15, %s1019_s15  }
   0x7   : > { %s27_s27 = sadd.s32 1, %s785_s22  ;;  %s30_s28 = sadd.s32 1, %s789_s23 }
   0x8   : > { %p28_p0 = scmp.ge.s32.totalorder %s27_s27, 2  ;;  %s39_s29 = sadd.s32 1, %s773_s19 }
   0x9   : > { %p46_p1 = scmp.ne.s32.totalorder %s773_s19, %s769_s18  ;;  %p47_p2 = scmp.eq.s32.totalorder %s793_s24, 0 }
   0xa   : > { %s1029_s27 = smov (%p28_p0, %s27_s27), 0  ;;  %s1031_s28 = smov (!%p28_p0, %s30_s28), %s789_s23 }
   0xb   : > { %s35_s30 = ssub.s32 %s785_s22, %s1029_s27  ;;  %p887_p3 = por %p47_p2, %p46_p1 }
   0xc   : > { %p32_p4 = scmp.ge.s32.totalorder %s1031_s28, 2  ;;  %s107_s6 = sadd.s32 1, %s765_s17 }
   0xd   : > { %p117_p5 = scmp.ne.s32.totalorder %s765_s17, %s761_s16  ;;  %p118_p6 = scmp.eq.s32.totalorder %s567_s25, 3 }
   0xe   : > { %s1033_s28 = smov (%p32_p4, %s1031_s28), 0  ;;  %p123_p8 = scmp.ne.s32.totalorder %s761_s16, %s757_s15 }
   0xf   : > { %1015 = sst [smem:[#allocation7_spill]] %s1033_s28  ;;  %p896_p7 = por %p118_p6, %p117_p5 }
  0x10   : > { %s34_s8 = ssub.s32 %s789_s23, %s1033_s28  ;;  %p124_p9 = scmp.eq.s32.totalorder %s568_s26, 3 }
  0x11   : > { %s36_s9 = sor.u32 %s35_s30, %s34_s8  ;;  %p105_p10 = scmp.eq.s32.totalorder %s34_s8, 0 }
  0x12   : > { %p37_p11 = scmp.eq.s32.totalorder %s36_s9, 0  ;;  %p904_p12 = por %p124_p9, %p123_p8 }
  0x13   : > { %s909_s11 = scalar_select %p105_p10, %s765_s17, %s107_s6  }
  0x14   : > { %s912_s12 = scalar_select %p37_p11, %s773_s19, %s39_s29  }
  0x15   : > { %p570_p13 = scmp.ge.s32.totalorder %s793_s24, 4 }
  0x17   : > { %172 = sbr.rel (%p570_p13) target bundleno = 40 (0x28), region = 24 }
  0x1e   : > { %175 = sbr.rel (!%p887_p3) target bundleno = 40 (0x28), region = 28  ;;  %s177_s13 = sand.u32 (%p887_p3), 1, %s773_s19  }
  0x1f   : > { %s590_s14 = smul.u32 (%p887_p3), 24, %s177_s13  ;;  %s571_s25 = sshll.u32 (%p887_p3), %s785_s22, 2 }
  0x20   : > { %s591_s26 = smul.u32 (%p887_p3), 24, %s789_s23 }
  0x21   : > { %s179_s28 = scalar_lea.vmem (%p887_p3), [#allocation3], %s590_s14 }
  0x22   : > { %s182_s30 = sadd.s32 (%p887_p3), %s591_s26, %s571_s25 }
  0x23   : > { %s572_s8 = sshll.u32 (%p887_p3), %s182_s30, 1 }
  0x24   : > { %s184_s29 = scalar_lea.vmem (%p887_p3), %s1008_s0, %s572_s8 }
  0x25   : > { %v216_v0 = vld [vmem:[%s184_s29] sm:$0xff]  ;;  %v218_v1 = vld [vmem:[%s184_s29 + $0x10] sm:$0xff] }
  0x26   : > { %v220_v2 = vld [vmem:[%s184_s29 + $0x20] sm:$0xff]  ;;  %217 = vst [vmem:[%s179_s28] sm:$0xff] %v216_v0  ;;  %219 = vst [vmem:[%s179_s28 + $0x8] sm:$0xff] %v218_v1 }
  0x27   : > { %221 = vst [vmem:[%s179_s28 + $0x10] sm:$0xff] %v220_v2 }
  0x28 PF: > { %p573_p0 = scmp.ge.s32.totalorder %s793_s24, 1  ;;  %p226_p1 = scmp.lt.s32.totalorder %s793_s24, 5 }
  0x2a   : > { %p227_p2 = pnand %p573_p0, %p226_p1 }
  0x2b   : > { %s233_s5 = sand.u32 (!%p227_p2), 1, %s769_s18   ;;  %s253_s13 = sand.u32 (!%p227_p2), 1, %s761_s16  }
  0x2c   : > { %230 = sbr.rel (%p227_p2) target bundleno = 481 (0x1e1), region = 66  ;;  %p262_p3 = scmp.lt.s32.totalorder (!%p227_p2), %s781_s21, 1 }
  0x2d   : > { %s592_s25 = smul.u32 (!%p227_p2), 24, %s233_s5  ;;  %s936_s6 = scalar_lea.vmem (!%p227_p2), [#allocation4], %s253_s13 }
  0x2e   : > { %p575_p4 = scmp.ne.s32.totalorder (!%p227_p2), %s777_s20, 0 }
  0x2f   : > { %s235_s9 = scalar_lea.vmem (!%p227_p2), [#allocation3], %s592_s25 }
  0x33   : > { %s263_s14 = scalar_select %p262_p3, %s781_s21, 1 }
  0x34   : > { %269 = sbr.rel (%p575_p4) target bundleno = 59 (0x3b), region = 74  ;;  %v795_v3 = vmov (!%p575_p4), 0.0  }
  0x35   : > { %s574_s26 = sshll.u32 %s263_s14, 2  ;;  %270 = vst [vmem:[#allocation2] sm:$0xf] (!%p575_p4), %v795_v3  ;;  %271 = vst [vmem:[#allocation2 + $0x4] sm:$0xf] (!%p575_p4), %v795_v3 }
  0x36   : > { %s932_s8 = scalar_lea.vmem %s1012_s4, %s574_s26  ;;  %272 = vst [vmem:[#allocation2 + $0x8] sm:$0xf] (!%p575_p4), %v795_v3 }
  0x3b PF: > { %v273_v4 = vld [vmem:[%s235_s9] sm:$0x3]  ;;  %v279_v5 = vld [vmem:[%s235_s9 + $0x2] sm:$0x3]  ;;  %v288_v6 = vld [vmem:[%s235_s9 + $0x4] sm:$0x3] }
  0x3c   : > { %v276_v7 = vunpack.c.l.bf16 %v273_v4  ;;  %v282_v8 = vunpack.c.l.bf16 %v279_v5  ;;  %v291_v9 = vunpack.c.l.bf16 %v288_v6  ;;  %v297_v10 = vld [vmem:[%s235_s9 + $0x6] sm:$0x3]  ;;  %v274_v11 = vld [vmem:[%s235_s9 + $0x8] sm:$0x3]  ;;  %v280_v13 = vld [vmem:[%s235_s9 + $0xa] sm:$0x3] }
  0x3d   : > { %v277_v12 = vunpack.c.l.bf16 %v274_v11  ;;  %v289_v14 = vld [vmem:[%s235_s9 + $0xc] sm:$0x3]  ;;  %v298_v15 = vld [vmem:[%s235_s9 + $0xe] sm:$0x3]  ;;  %v300_v17 = vunpack.c.l.bf16 %v297_v10  ;;  %v283_v18 = vunpack.c.l.bf16 %v280_v13  ;;  %v275_v20 = vld [vmem:[%s235_s9 + $0x10] sm:$0x3] }
  0x3e   : > { %v285_v16 = vadd.f32 %v282_v8, %v276_v7  ;;  %v292_v19 = vunpack.c.l.bf16 %v289_v14  ;;  %v281_v21 = vld [vmem:[%s235_s9 + $0x12] sm:$0x3]  ;;  %v278_v22 = vunpack.c.l.bf16 %v275_v20  ;;  %v290_v24 = vld [vmem:[%s235_s9 + $0x14] sm:$0x3]  ;;  %v299_v25 = vld [vmem:[%s235_s9 + $0x16] sm:$0x3]  ;;  %v301_v28 = vunpack.c.l.bf16 %v298_v15 }
  0x3f   : > { %v284_v23 = vunpack.c.l.bf16 %v281_v21  ;;  %v286_v27 = vadd.f32 %v283_v18, %v277_v12  ;;  %v293_v29 = vunpack.c.l.bf16 %v290_v24  ;;  %v306_v30 = vld [vmem:[#allocation2] sm:$0xf]  ;;  %v302_v32 = vunpack.c.l.bf16 %v299_v25  ;;  %v307_v35 = vld [vmem:[#allocation2 + $0x4] sm:$0xf]  ;;  %v308_v39 = vld [vmem:[#allocation2 + $0x8] sm:$0xf] }
  0x40   : > { %v294_v26 = vadd.f32 %v291_v9, %v285_v16  ;;  %p576_p5 = scmp.ne.s32.totalorder %s777_s20, 1 }
  0x41   : > { %v287_v31 = vadd.f32 %v284_v23, %v278_v22  ;;  %v295_v34 = vadd.f32 %v292_v19, %v286_v27  ;;  %vm322_vm0 = vcmask (!%p576_p5), 1043456   ;;  %v796_v49 = vmov (!%p576_p5), 0.0   ;;  %v332_v50 = vld [vmem:[%s1009_s1] sm:$0xf] (!%p576_p5) }
  0x42   : > { %v303_v33 = vadd.f32 %v300_v17, %v294_v26  ;;  %585 = vmatprep.subr.mxu0 (!%p576_p5), %v796_v49  ;;  %vm797_vm1 = vmmov (!%p576_p5), 0   ;;  %v343_v51 = vlaneseq (!%p576_p5)  ;;  %vm357_vm2 = vcmask (!%p576_p5), 1041409   ;;  %v577_v63 = vld [vmem:[%s1010_s2] ss:$0 sm:$0xff] (!%p576_p5) }
  0x43   : > { %v296_v36 = vadd.f32 %v293_v29, %v287_v31  ;;  %v304_v38 = vadd.f32 %v301_v28, %v295_v34  ;;  %318 = sbr.rel (%p576_p5) target bundleno = 457 (0x1c9), region = 78  ;;  %586 = vmatpush3.msk.msra.mxu0 (!%p576_p5), %vm322_vm0, %v332_v50  ;;  %587 = vmatprep.mubr.msk.f32.mxu0 (!%p576_p5), %vm797_vm1, %v796_v49  ;;  %vm359_vm3 = vcmask (!%p576_p5), 1042434   ;;  %vm361_vm4 = vcmask (!%p576_p5), 31744  }
  0x44   : > { %v309_v37 = vadd.f32 %v306_v30, %v303_v33  ;;  %v344_v52 = vand.u32 (!%p576_p5), 127, %v343_v51  ;;  %v346_v53 = vshrl.u32 (!%p576_p5), %v343_v51, 7  ;;  %vm437_vm5 = vcmask (!%p576_p5), 256000  }
  0x45   : > { %v305_v40 = vadd.f32 %v302_v32, %v296_v36  ;;  %v310_v41 = vadd.f32 %v307_v35, %v304_v38  ;;  %vm446_vm6 = vcmask (!%p576_p5), 253952  }
  0x46   : > { %312 = vst [vmem:[#allocation2] sm:$0xf] %v309_v37  ;;  %v347_v55 = vsub.s32 (!%p576_p5), %v344_v52, %v346_v53 }
  0x47   : > { %v311_v42 = vadd.f32 %v308_v39, %v305_v40  ;;  %313 = vst [vmem:[#allocation2 + $0x4] sm:$0xf] %v310_v41 }
  0x49   : > { %314 = vst [vmem:[#allocation2 + $0x8] sm:$0xf] %v311_v42 }
  0x4d   : > { %v319_v43 = vld [vmem:[#allocation2] sm:$0xf] }
  0x4e   : > { %v320_v44 = vld [vmem:[#allocation2 + $0x4] sm:$0xf]  ;;  %v323_v45 = vsel %vm322_vm0, %v319_v43, 0.0 }
  0x4f   : > { %324 = vadd.xlane.f32.xlu0 %v323_v45  ;;  %v326_v48 = vsel %vm322_vm0, %v320_v44, 0.0 }
  0x50   : > { %v321_v46 = vld [vmem:[#allocation2 + $0x8] sm:$0xf] }
  0x51   : > { %v329_v47 = vsel %vm322_vm0, %v321_v46, 0.0 }
  0x52   : > { %330 = vadd.xlane.f32.xlu1 %v329_v47 }
  0x53   : > { %327 = vadd.xlane.f32.xlu0 %v326_v48 }
  0xdc   : > { %v325_v54 = vpop.xlane.xlu0 %324 }
  0xdd   : > { %v348_v59 = vrot.slane %v325_v54, %v347_v55 }
  0xdf   : > { %v331_v56 = vpop.xlane.xlu1 %330 }
  0xe0   : > { %v328_v57 = vpop.xlane.xlu0 %327  ;;  %v356_v58 = vrot.slane %v331_v56, %v347_v55 }
  0xe1   : > { %v352_v60 = vrot.slane %v328_v57, %v347_v55 }
  0xe3   : > { %v358_v61 = vsel %vm357_vm2, %v352_v60, %v348_v59 }
  0xe4   : > { %v360_v62 = vsel %vm359_vm3, %v356_v58, %v358_v61 }
  0xe5   : > { %588 = vmatmul.mubr.msk.f32.vlgmr.msra.gmra.mrb[0].mxu0 %vm361_vm4, %v360_v62 }
 0x1b8   : > { %v433_v0 = vpop.f32.mrb[0].mxu0 }
 0x1b9   : > { %v434_v1 = vadd.f32 %v577_v63, %v433_v0  ;;  %v589_v2 = vpop.f32.mrb[1].mxu0 }
 0x1bb   : > { %438 = vst.msk [vmem:[%s932_s8] sm:$0x7] %vm437_vm5, %v434_v1  ;;  %v439_v3 = vsel %vm437_vm5, %v434_v1, -inf }
 0x1bc   : > { %v440_v4 = vrot.slane %v439_v3, 4 }
 0x1be   : > { %v441_v5 = vmax.f32 %v439_v3, %v440_v4 }
 0x1c0   : > { %v442_v6 = vrot.slane %v441_v5, 2 }
 0x1c2   : > { %v443_v7 = vmax.f32 %v441_v5, %v442_v6 }
 0x1c4   : > { %v444_v8 = vrot.slane %v443_v7, 1 }
 0x1c6   : > { %v445_v9 = vmax.f32 %v443_v7, %v444_v8 }
 0x1c8   : > { %447 = vst.msk [vmem:[%s936_s6] sm:$0x1] %vm446_vm6, %v445_v9 }
 0x1c9 PF: > { %s580_s25 = sshll.u32 %s781_s21, 4  ;;  %s465_s30 = sshll.u32 %s936_s6, 4  ;;  %s466_s30 = int_to_ptr.vmem [resolvable:$true] %s465_s30 }
 0x1ca   : > { %s952_s28 = scalar_lea.hbm %s1011_s3, %s580_s25  ;;  %s449_s8 = scalar_lea.sflag [#allocation5], %s253_s13 }
 0x1cb   : > { %s683_s9 = scalar_lea.vmem %s466_s30, 16  ;;  %s798_s18 = smov [#allocation4]  }
 0x1cc   : > { %p684_p6 = scmp.ne.s32.totalorder %s466_s30, %s683_s9  ;;  %s687_s29 = sshll.u32 %s798_s18, 4  ;;  %s688_s29 = int_to_ptr.vmem [resolvable:$false] %s687_s29 }
 0x1cd   : > { %s689_s20 = scalar_lea.vmem %s688_s29, 32  ;;  %p690_p10 = scmp.lt.s32.totalorder %s466_s30, %s688_s29 }
 0x1ce   : > { %p685_p8 = pnand %p684_p6, %p896_p7  ;;  %p691_p11 = scmp.lt.s32.totalorder %s689_s20, %s683_s9 }
 0x1d0   : > { %p686_p9 = pneg %p685_p8  ;;  %p692_p13 = por %p691_p11, %p690_p10 }
 0x1d2   : > { %p693_p0 = pnand %p692_p13, %p686_p9 }
 0x1d4   : > { %696 = shalt.err (!%p693_p0)
}
 0x1d5   : > { %s697_s21 = scalar_lea.hbm %s952_s28, 16  ;;  %s701_s5 = scalar_lea.hbm %s1011_s3, 32 }
 0x1d6   : > { %p698_p1 = scmp.ne.s32.totalorder %s952_s28, %s697_s21  ;;  %p702_p4 = scmp.lt.u32.totalorder %s952_s28, %s1011_s3 }
 0x1d7   : > { %p703_p5 = scmp.lt.u32.totalorder %s701_s5, %s697_s21  ;;  %p705_p8 = scmp.lt.u32.totalorder %s697_s21, %s952_s28 }
 0x1d8   : > { %p699_p2 = pnand %p698_p1, %p896_p7 }
 0x1d9   : > { %p704_p6 = por %p703_p5, %p702_p4 }
 0x1da   : > { %p700_p3 = pneg %p699_p2 }
 0x1db   : > { %p706_p9 = por %p705_p8, %p704_p6 }
 0x1dd   : > { %p707_p10 = pnand %p706_p9, %p700_p3 }
 0x1df   : > { %710 = shalt.err (!%p707_p10)
}
 0x1e0   : > { %593 = dma.vmem_to_hbm [thread:$0]  (%p896_p7), %s466_s30, 16, %s952_s28, %s449_s8  }
 0x1e1 PF: > { %p599_p11 = scmp.ge.s32.totalorder %s793_s24, 2  ;;  %s480_s26 = sand.u32 1, %s757_s15  }
 0x1e2   : > { %s481_s9 = scalar_lea.sflag [#allocation5], %s480_s26 }
 0x1e3   : > { %p596_p13 = pnand %p599_p11, %p904_p12 }
 0x1e5   : > { %752 = dma.done.wait (!%p596_p13), %s481_s9, 16  }
 0x1e6   : > { %754 = vsyncadd (!%p596_p13), %s481_s9, 4294967280  ;;  %s18_s24 = sadd.s32 1, %s793_s24   ;;  %s1018_s7 = sld [smem:[#allocation7_spill]] }
 0x1e7   : > { %p15_p0 = scmp.ge.s32.totalorder %s18_s24, 6   ;;  %s1019_s15 = smov %s761_s16 }
 0x1e8   : > { %s1020_s16 = smov %s765_s17  ;;  %s1021_s17 = smov %s909_s11 }
 0x1e9   : > { %s1022_s18 = smov %s773_s19  ;;  %s1023_s19 = smov %s912_s12 }
 0x1ea   : > { %s1024_s20 = smov %s785_s22  ;;  %s1025_s21 = smov %s789_s23 }
 0x1eb   : > { %s1026_s22 = smov %s1029_s27  ;;  %17 = sbr.rel (!%p15_p0) target bundleno = 6 (0x6), region = 130 }
 0x1ec   : > { %s1027_s23 = smov %s1018_s7 }
 0x1f2   :  { %492 = vsyncpa [#allocation5], 1 }
 0x1f3   :  { %494 = vsyncpa [#allocation5 + $0x1], 1 }

</bundles_post_ra>
